<compile_context>
chip_gen: v5e
topology: v5e:2x2
jax: 0.10.0
libtpu: 0.0.40
codegen_flags: <defaults>
</compile_context>

<pallas_src>
import functools
import math

import jax
import jax.numpy as jnp
from jax.experimental import pallas as pl
from jax.experimental.pallas import tpu as pltpu


# -----------------------------------------------------------------------------
# Module "buffer" setup (host-side, deterministic).  Same formula as the
# PyTorch PositionalEncoding buffer: pe has shape (max_len, 1, d_model).
# -----------------------------------------------------------------------------
def make_pe(d_model: int, max_len: int = 5000) -> jnp.ndarray:
    position = jnp.arange(0, max_len, dtype=jnp.float32)[:, None]            # (L, 1)
    div_term = jnp.exp(jnp.arange(0, d_model, 2, dtype=jnp.float32)
                       * (-math.log(10000.0) / d_model))                     # (D/2,)
    angles = position * div_term                                             # (L, D/2)
    pe = jnp.zeros((max_len, d_model), dtype=jnp.float32)
    pe = pe.at[:, 0::2].set(jnp.sin(angles))
    pe = pe.at[:, 1::2].set(jnp.cos(angles))
    return pe[:, None, :]                                                    # (L, 1, D)


# -----------------------------------------------------------------------------
# Kernels.  Pure element-wise, HBM-roofline-bound.  Math in f32, cast on store.
# -----------------------------------------------------------------------------
def _add_pe_kernel(x_ref, pe_ref, o_ref):
    y = x_ref[...].astype(jnp.float32) + pe_ref[...]
    o_ref[...] = y.astype(o_ref.dtype)


def _add_pe_dropout_kernel(x_ref, pe_ref, u_ref, o_ref, *, p: float):
    # Inverted dropout: zero with prob p, scale survivors by 1/(1-p).
    # Single fused multiply by the mask (no jnp.where compare+select vreg);
    # `scale` is a hoisted Python constant.
    scale = 1.0 / (1.0 - p)
    y = x_ref[...].astype(jnp.float32) + pe_ref[...]
    keep = (u_ref[...] >= p).astype(jnp.float32)
    o_ref[...] = (y * (keep * scale)).astype(o_ref.dtype)


# -----------------------------------------------------------------------------
# Tiling heuristics (review items 1 & 2).
# -----------------------------------------------------------------------------
_TARGET_BLOCK_BYTES = 2 * 1024 * 1024   # 0.5-2 MiB blocks hit >=85% of HBM roofline
_VMEM_BUDGET_BYTES = 24 * 1024 * 1024   # conservative for v7x (64 MiB phys / 32 scoped)
_VMEM_LIMIT_BYTES = 32 * 1024 * 1024    # explicit scoped-VMEM limit for all calls


def _round_up(v: int, m: int) -> int:
    return ((v + m - 1) // m) * m


def _auto_seq_tile(seq_len: int, row_bytes_vmem: int, n_block_operands: int) -> int:
    """Largest seq tile such that all double-buffered blocks fit the VMEM budget."""
    rows_budget = max(1, _VMEM_BUDGET_BYTES // (2 * n_block_operands * row_bytes_vmem))
    rows_target = max(1, _TARGET_BLOCK_BYTES // row_bytes_vmem)
    ts = min(seq_len, rows_budget, rows_target)
    if seq_len >= 8:
        ts = max(8, (ts // 8) * 8)      # sublane-dense tiles
    else:
        ts = seq_len
    return max(1, ts)


# -----------------------------------------------------------------------------
# Wrapper: out = dropout(x + pe[:S], p).   x: (S, B, D), pe: (max_len, 1, D).
# -----------------------------------------------------------------------------
def positional_encoding(x, pe, *, p: float = 0.1, training: bool = False,
                        rng_key=None, seq_tile: int | None = None,
                        donate_x: bool = False):
    S, B, D = x.shape
    if pe.shape[0] < S:
        raise ValueError("pe buffer shorter than sequence length")
    if training and not (0.0 <= p < 1.0):
        raise ValueError("dropout p must be in [0, 1) for the training path")

    pe_sd = pe[:S, 0, :].astype(jnp.float32)            # (S, D) host-side slice (glue)
    use_dropout = training and p > 0.0
    if use_dropout and rng_key is None:
        rng_key = jax.random.PRNGKey(0)
    # TODO(synk): on-TPU the mask could be drawn in-kernel with pltpu.prng_seed /
    # prng_random_bits (saves one HBM read in train mode); omitted because those
    # primitives have no CPU/interpret lowering.

    n_ops = 4 if use_dropout else 3                     # x, pe, (u,) out — all blocked
    out_shape_3d = jax.ShapeDtypeStruct((S, B, D), x.dtype)
    lane_dense = (B == 1) or (D % 128 == 0)
    io_alias = {0: 0} if donate_x else {}

    if lane_dense:
        # ---- Lane/sublane-dense path: x viewed as (S, B*D), (ts, D) blocks,
        # ---- grid = (seq tiles, batch).  pe block index is constant over the
        # ---- inner batch axis -> fetched once per seq tile.
        x2 = x.reshape(S, B * D)                        # contiguous minor dims: free
        row_bytes = _round_up(D, 128) * 4               # one f32 block row in VMEM
        ts = seq_tile or _auto_seq_tile(S, row_bytes, n_ops)
        grid = (pl.cdiv(S, ts), B)

        x_spec = pl.BlockSpec((ts, D), lambda i, b: (i, b))
        pe_spec = pl.BlockSpec((ts, D), lambda i, b: (i, 0))
        o_spec = pl.BlockSpec((ts, D), lambda i, b: (i, b))
        cp = pltpu.CompilerParams(dimension_semantics=("parallel", "parallel"),
                                  vmem_limit_bytes=_VMEM_LIMIT_BYTES)

        if use_dropout:
            u = jax.random.uniform(rng_key, (S, B * D), dtype=jnp.float32)
            out2 = pl.pallas_call(
                functools.partial(_add_pe_dropout_kernel, p=p),
                out_shape=jax.ShapeDtypeStruct((S, B * D), x.dtype),
                grid=grid,
                in_specs=[x_spec, pe_spec, x_spec],
                out_specs=o_spec,
                compiler_params=cp,
                input_output_aliases=io_alias,
            )(x2, pe_sd, u)
        else:
            out2 = pl.pallas_call(
                _add_pe_kernel,
                out_shape=jax.ShapeDtypeStruct((S, B * D), x.dtype),
                grid=grid,
                in_specs=[x_spec, pe_spec],
                out_specs=o_spec,
                compiler_params=cp,
                input_output_aliases=io_alias,
            )(x2, pe_sd)
        return out2.reshape(S, B, D)

    # ---- Fallback path (D not a multiple of 128 and B > 1): (ts, B, D) blocks
    # ---- whose last two dims equal the full array dims (always layout-legal).
    pe_b = pe_sd[:, None, :]                            # (S, 1, D), broadcast over B
    row_bytes = _round_up(B, 8) * _round_up(D, 128) * 4
    ts = seq_tile or _auto_seq_tile(S, row_bytes, n_ops)
    grid = (pl.cdiv(S, ts),)

    x_spec = pl.BlockSpec((ts, B, D), lambda i: (i, 0, 0))
    pe_spec = pl.BlockSpec((ts, 1, D), lambda i: (i, 0, 0))
    o_spec = pl.BlockSpec((ts, B, D), lambda i: (i, 0, 0))
    cp = pltpu.CompilerParams(dimension_semantics=("parallel",),
                              vmem_limit_bytes=_VMEM_LIMIT_BYTES)

    if use_dropout:
        u = jax.random.uniform(rng_key, (S, B, D), dtype=jnp.float32)
        return pl.pallas_call(
            functools.partial(_add_pe_dropout_kernel, p=p),
            out_shape=out_shape_3d,
            grid=grid,
            in_specs=[x_spec, pe_spec, x_spec],
            out_specs=o_spec,
            compiler_params=cp,
            input_output_aliases=io_alias,
        )(x, pe_b, u)
    return pl.pallas_call(
        _add_pe_kernel,
        out_shape=out_shape_3d,
        grid=grid,
        in_specs=[x_spec, pe_spec],
        out_specs=o_spec,
        compiler_params=cp,
        input_output_aliases=io_alias,
    )(x, pe_b)


# -----------------------------------------------------------------------------
# Demo / correctness checks.
# -----------------------------------------------------------------------------
if __name__ == "__main__":
    key = jax.random.PRNGKey(0)
    k1, k2, k3 = jax.random.split(key, 3)

    # Case 1: lane-dense path (d_model multiple of 128, tiny batch) — eval + train.
    S1, B1, D1 = 8, 2, 128
    pe1 = make_pe(D1, max_len=64)
    x1 = jax.random.normal(k1, (S1, B1, D1), dtype=jnp.float32)

    out1 = jax.block_until_ready(positional_encoding(x1, pe1, p=0.1, training=False))
    ref1 = x1 + pe1[:S1]
    assert out1.shape == (S1, B1, D1)
    assert jnp.allclose(out1, ref1, atol=1e-6), "eval mismatch (lane-dense path)"

    out1_tr = jax.block_until_ready(
        positional_encoding(x1, pe1, p=0.1, training=True, rng_key=k3))
    assert out1_tr.shape == (S1, B1, D1)
    survived = out1_tr != 0
    assert jnp.allclose(jnp.where(survived, out1_tr, 0.0),
                        jnp.where(survived, ref1 / (1.0 - 0.1), 0.0),
                        atol=1e-5), "train mismatch (inverted dropout scaling)"

    # Case 2: fallback path (small d_model, small batch) with a ragged seq tile.
    S2, B2, D2 = 12, 2, 32
    pe2 = make_pe(D2, max_len=64)
    x2 = jax.random.normal(k2, (S2, B2, D2), dtype=jnp.float32)
    out2 = jax.block_until_ready(positional_encoding(x2, pe2, training=False))
    ref2 = x2 + pe2[:S2]
    assert out2.shape == (S2, B2, D2)
    assert jnp.allclose(out2, ref2, atol=1e-6), "eval mismatch (fallback path)"

    print("KERNEL_OK")
</pallas_src>

<mosaic_0001>
module attributes {stable_mosaic.version = 11 : i64} {
  func.func @_add_pe_kernel(%arg0: i32, %arg1: i32, %arg2: memref<8x128xf32, #tpu.memory_space<vmem>>, %arg3: memref<8x128xf32, #tpu.memory_space<vmem>>, %arg4: memref<8x128xf32, #tpu.memory_space<vmem>>) attributes {dimension_semantics = [#tpu.dimension_semantics<parallel>, #tpu.dimension_semantics<parallel>], iteration_bounds = array<i64: 1, 2>, scalar_prefetch = 0 : i64, scratch_operands = 0 : i64, tpu.core_type = #tpu.core_type<tc>, window_params = [{transform_indices = @transform_0, window_bounds = array<i64: 8, 128>}, {transform_indices = @transform_1, window_bounds = array<i64: 8, 128>}, {transform_indices = @transform_2, window_bounds = array<i64: 8, 128>}]} {
    %c0 = arith.constant 0 : index
    %c0_0 = arith.constant 0 : index
    %0 = vector.load %arg2[%c0, %c0_0] : memref<8x128xf32, #tpu.memory_space<vmem>>, vector<8x128xf32>
    %c0_1 = arith.constant 0 : index
    %c0_2 = arith.constant 0 : index
    %1 = vector.load %arg3[%c0_1, %c0_2] : memref<8x128xf32, #tpu.memory_space<vmem>>, vector<8x128xf32>
    %2 = arith.addf %0, %1 : vector<8x128xf32>
    %c0_3 = arith.constant 0 : index
    %c0_4 = arith.constant 0 : index
    %3 = vector.load %arg4[%c0_3, %c0_4] : memref<8x128xf32, #tpu.memory_space<vmem>>, vector<8x128xf32>
    tpu.vector_store %arg4[%c0_3, %c0_4], %2 {strides = array<i32>} : memref<8x128xf32, #tpu.memory_space<vmem>>, vector<8x128xf32>,
    return
  }
  func.func @transform_0(%arg0: i32, %arg1: i32) -> (i32, i32) {
    %c0_i32 = arith.constant 0 : i32
    return %arg0, %arg1 : i32, i32
  }
  func.func @transform_1(%arg0: i32, %arg1: i32) -> (i32, i32) {
    %c0_i32 = arith.constant 0 : i32
    %c0_i32_0 = arith.constant 0 : i32
    return %arg0, %c0_i32 : i32, i32
  }
  func.func @transform_2(%arg0: i32, %arg1: i32) -> (i32, i32) {
    %c0_i32 = arith.constant 0 : i32
    return %arg0, %arg1 : i32, i32
  }
}

</mosaic_0001>

<bundles_post_ra>
// kernel: tpu_custom_call.1
= control target key start
LH: loop header
LB: loop body
LE: loop exit
PB: predicated region body
PF: predicated region fallthrough
CT: control target
= control target key end

     0   :  { %7 = vsyncpa [#allocation3], 0  ;;  %s718_s0 = inlined_call_operand.hbm [shape: f32[8,256], index: 0, kind: input, shape index: {}]   ;;  %s719_s1 = inlined_call_operand.hbm [shape: f32[8,128], index: 1, kind: input, shape index: {}]   ;;  %s720_s2 = inlined_call_operand.hbm [shape: f32[8,256], index: 2, kind: output, shape index: {}]  }
   0x1   :  { %9 = vsyncpa [#allocation3 + $0x1], 0 }
   0x2   :  { %10 = vsyncpa [#allocation6], 0 }
   0x3   :  { %11 = vsyncpa [#allocation4], 0 }
   0x4   :  { %13 = vsyncpa [#allocation4 + $0x1], 0  ;;  %s569_s9 = smov 0   ;;  %s571_s10 = smov 0  }
   0x5   :  { %s573_s11 = smov 0   ;;  %s575_s12 = smov 0  }
   0x6   :  { %s577_s13 = smov 0   ;;  %s579_s14 = smov 0  }
   0x7 LB: > { %s317_s15 = sadd.s32 4294967295, %s551_s14   ;;  %s318_s16 = sadd.s32 4294967294, %s551_s14   ;;  %s551_s14 = sphi %s579_s14, %s19_s14   ;;  %s547_s13 = sphi %s577_s13, %s732_s13   ;;  %s543_s12 = sphi %s575_s12, %s731_s12   ;;  %s539_s11 = sphi %s573_s11, %s730_s11   ;;  %s535_s10 = sphi %s571_s10, %s729_s10   ;;  %s531_s9 = sphi %s569_s9, %s728_s9  }
   0x8   : > { %p53_p0 = scmp.ne.s32.totalorder %s535_s10, %s531_s9  ;;  %p603_p1 = scmp.eq.s32.totalorder %s317_s15, 0 }
   0x9   : > { %p607_p2 = scmp.eq.s32.totalorder %s317_s15, 1  ;;  %p111_p3 = scmp.eq.s32.totalorder %s318_s16, 1 }
   0xa   : > { %p613_p4 = por %p603_p1, %p53_p0  ;;  %p319_p5 = scmp.ge.s32.totalorder %s551_s14, 1 }
   0xb   : > { %p618_p6 = por %p111_p3, %p53_p0  ;;  %p118_p7 = scmp.lt.s32.totalorder %s551_s14, 3 }
   0xc   : > { %s132_s23 = sshll.u32 %s719_s1, 4  ;;  %p321_p9 = scmp.ge.s32.totalorder %s551_s14, 2  ;;  %s133_s23 = int_to_ptr.hbm [resolvable:$true] %s132_s23 }
   0xd   : > { %p626_p8 = pnand %p319_p5, %p118_p7  ;;  %s553_s25 = smov [#allocation5]  }
   0xe   : > { %s134_s26 = sshll.u32 %s553_s25, 4  ;;  %s28_s27 = sadd.s32 1, %s547_s13  ;;  %s135_s26 = int_to_ptr.vmem [resolvable:$true] %s134_s26 }
   0xf   : > { %p340_p10 = pneg %p626_p8  ;;  %p29_p12 = scmp.ge.s32.totalorder %s28_s27, 2 }
  0x10   : > { %s40_s28 = sadd.s32 1, %s539_s11  ;;  %p47_p13 = scmp.ne.s32.totalorder %s539_s11, %s535_s10 }
  0x11   : > { %p341_p11 = pnand %p340_p10, %p603_p1  ;;  %p48_p0 = scmp.eq.s32.totalorder %s551_s14, 0 }
  0x12   : > { %s734_s27 = smov (%p29_p12, %s28_s27), 0  ;;  %p648_p5 = por %p607_p2, %p47_p13 }
  0x13   : > { %343 = dma.hbm_to_vmem [thread:$0]  (!%p341_p11), %s133_s23, 128, %s135_s26, [#allocation6]  }
  0x14   : > { %p642_p3 = por %p48_p0, %p47_p13  ;;  %s36_s3 = ssub.s32 %s547_s13, %s734_s27 }
  0x15   : > { %p353_p7 = scmp.lt.s32.totalorder %s551_s14, 2  ;;  %p38_p10 = scmp.eq.s32.totalorder %s36_s3, 0 }
  0x16   : > { %s145_s4 = sand.u32 1, %s539_s11   ;;  %s323_s7 = sshll.u32 %s547_s13, 3 }
  0x17   : > { %s322_s5 = sshll.u32 %s145_s4, 3  ;;  %s155_s16 = scalar_lea.hbm %s718_s0, %s323_s7 }
  0x18   : > { %s657_s6 = scalar_select %p38_p10, %s539_s11, %s40_s28  }
  0x19   : > { %s149_s21 = scalar_lea.vmem [#allocation2], %s322_s5  ;;  %s157_s18 = sshll.u32 %s155_s16, 4  ;;  %s158_s18 = int_to_ptr.hbm [resolvable:$true] %s157_s18 }
  0x1a   : > { %s159_s22 = sshll.u32 %s149_s21, 4  ;;  %p345_p2 = pnand %p353_p7, %p642_p3  ;;  %s160_s22 = int_to_ptr.vmem [resolvable:$true] %s159_s22 }
  0x1b   : > { %s146_s23 = scalar_lea.sflag [#allocation3], %s145_s4  ;;  %168 = sbr.rel (%p626_p8) target bundleno = 50 (0x32), region = 28 }
  0x1c   : > { %347 = dma.hbm_to_vmem [thread:$0]  (!%p345_p2), %s158_s18, 128, %s160_s22, %s146_s23  }
  0x1d   : > { %s668_s25 = sand.u32 (!%p626_p8), 1, %s535_s10  }
  0x1e   : > { %s325_s26 = sshll.u32 (!%p626_p8), %s668_s25, 3  ;;  %s171_s28 = scalar_lea.sflag (!%p626_p8), [#allocation3], %s668_s25 }
  0x1f   : > { %s174_s3 = scalar_lea.vmem (!%p626_p8), [#allocation2], %s325_s26 }
  0x20   : > { %518 = dma.done.wait (%p613_p4), %s171_s28, 128  }
  0x21   : > { %520 = vsyncadd (%p613_p4), %s171_s28, 4294967168 }
  0x22   : > { %522 = dma.done.wait (%p603_p1), [#allocation6], 128  }
  0x23   : > { %524 = vsyncadd (%p603_p1), [#allocation6], 4294967168  ;;  %s329_s24 = sshll.u32 %s543_s12, 3  ;;  %s200_s7 = scalar_lea.vmem [#allocation7], %s325_s26  ;;  %v201_v0 = vld [vmem:[%s174_s3] sm:$0xff]  ;;  %v202_v1 = vld [vmem:[#allocation5] sm:$0xff] }
  0x24   : > { %s218_s5 = scalar_lea.hbm %s720_s2, %s329_s24  ;;  %s220_s8 = sshll.u32 %s200_s7, 4  ;;  %v203_v2 = vadd.f32 %v202_v1, %v201_v0  ;;  %s221_s8 = int_to_ptr.vmem [resolvable:$true] %s220_s8 }
  0x25   : > { %s222_s15 = sshll.u32 %s218_s5, 4  ;;  %s206_s19 = scalar_lea.sflag [#allocation4], %s668_s25  ;;  %s223_s15 = int_to_ptr.hbm [resolvable:$true] %s222_s15 }
  0x26   : > { %204 = vst [vmem:[%s200_s7] sm:$0xff] %v203_v2  ;;  %s479_s17 = sshra.s32 %s223_s15, 4  ;;  %s485_s22 = scalar_lea.hbm %s720_s2, 16  ;;  %s480_s17 = int_to_ptr.hbm [resolvable:$true] %s479_s17 }
  0x27   : > { %s481_s16 = scalar_lea.hbm %s480_s17, 8  ;;  %p486_p11 = scmp.lt.s32.totalorder %s480_s17, %s720_s2 }
  0x28   : > { %p482_p1 = scmp.ne.s32.totalorder %s480_s17, %s481_s16  ;;  %p487_p12 = scmp.lt.s32.totalorder %s485_s22, %s481_s16 }
  0x2a   : > { %p483_p4 = pnand %p482_p1, %p648_p5  ;;  %p488_p13 = por %p487_p12, %p486_p11 }
  0x2c   : > { %p484_p8 = pneg %p483_p4 }
  0x2e   : > { %p489_p0 = pnand %p488_p13, %p484_p8 }
  0x30   : > { %492 = shalt.err (!%p489_p0)
}
  0x31   : > { %338 = dma.vmem_to_hbm [thread:$0]  (%p648_p5), %s221_s8, 128, %s223_s15, %s206_s19  }
  0x32 PF: > { %s234_s25 = sand.u32 1, %s531_s9   ;;  %p349_p3 = pnand %p321_p9, %p618_p6 }
  0x33   : > { %s235_s26 = scalar_lea.sflag [#allocation4], %s234_s25 }
  0x34   : > { %p350_p7 = pneg %p349_p3 }
  0x36   : > { %526 = dma.done.wait (%p350_p7), %s235_s26, 128  }
  0x37   : > { %528 = vsyncadd (%p350_p7), %s235_s26, 4294967168  ;;  %s19_s14 = sadd.s32 1, %s551_s14   ;;  %s728_s9 = smov %s535_s10 }
  0x38   : > { %p16_p10 = scmp.ge.s32.totalorder %s19_s14, 4   ;;  %s729_s10 = smov %s539_s11 }
  0x39   : > { %s730_s11 = smov %s657_s6  ;;  %s731_s12 = smov %s547_s13 }
  0x3a   : > { %s732_s13 = smov %s734_s27  ;;  %18 = sbr.rel (!%p16_p10) target bundleno = 7 (0x7), region = 78 }
  0x3f   :  { %241 = vsyncpa [#allocation3], 1 }
  0x40   :  { %243 = vsyncpa [#allocation3 + $0x1], 1 }
  0x41   :  { %244 = vsyncpa [#allocation6], 1 }
  0x42   :  { %245 = vsyncpa [#allocation4], 1 }
  0x43   :  { %247 = vsyncpa [#allocation4 + $0x1], 1 }

</bundles_post_ra>
